<compile_context>
chip_gen: v7x
topology: tpu7x:2x2x1
jax: 0.10.0
libtpu: 0.0.40
codegen_flags: <defaults>
</compile_context>

<pallas_src>
import functools

import jax
import jax.numpy as jnp
from jax.experimental import pallas as pl
from jax.experimental.pallas import tpu as pltpu

NEG_SLOPE = 0.2        # DGL GATConv default negative_slope
NEG_INF = -1e30        # finite masking sentinel (avoids -inf - -inf = NaN)
BLOCK_M = 256          # dst-row tile
BLOCK_K = 1024         # src-column tile (online-softmax reduction axis)
VMEM_LIMIT = 64 * 1024 * 1024


# --------------------------------------------------------------------------
# Kernel A: projection. feat = h @ W (lane-dense (N, H*F)), attention logits
# via one block-diagonal matmul, and (optionally) the learned residual (bf16).
# Tiled over node rows ('parallel').
# --------------------------------------------------------------------------
def project_kernel(h_ref, w_ref, attn_ref, *rest, num_heads, has_res_fc):
    if has_res_fc:
        wres_ref, feat_ref, er_ref, elt_ref, res_ref = rest
    else:
        feat_ref, er_ref, elt_ref = rest

    h_bf = h_ref[...].astype(jnp.bfloat16)

    # MXU: node projection (bf16 inputs, f32 accumulation).
    feat32 = jnp.dot(h_bf, w_ref[...], preferred_element_type=jnp.float32)   # (TM, H*F)
    feat_ref[...] = feat32.astype(feat_ref.dtype)       # single lane-dense bf16 store

    # One small MXU matmul gives el/er for all heads at once.
    # attn_ref is block-diagonal: cols [0:H) -> attn_l, cols [H:2H) -> attn_r.
    scores = jnp.dot(feat32, attn_ref[...], preferred_element_type=jnp.float32)  # (TM, 2H)
    er_ref[...] = scores[:, num_heads:]                  # (TM, H)  dst-side logits
    elt_ref[...] = scores[:, :num_heads].T               # (H, TM)  src-side logits (row layout)

    if has_res_fc:
        res_ref[...] = jnp.dot(h_bf, wres_ref[...],
                               preferred_element_type=jnp.float32).astype(res_ref.dtype)


# --------------------------------------------------------------------------
# Kernel B: masked edge softmax + neighbor aggregation + residual add.
# Grid: (dst-row tiles 'parallel', src-column tiles 'arbitrary').
# Online softmax: running max/sum/accumulator live in VMEM scratch; the
# normalization (1/s) and residual are applied on the last column step with a
# single lane-dense (TM, H*F) store.
# --------------------------------------------------------------------------
def attention_kernel(adj_ref, feat_ref, elt_ref, er_ref, res_ref, out_ref,
                     m_sc, l_sc, acc_sc, *, num_heads, out_feats):
    k = pl.program_id(1)

    @pl.when(k == 0)
    def _():
        m_sc[...] = jnp.full_like(m_sc, NEG_INF)
        l_sc[...] = jnp.zeros_like(l_sc)
        acc_sc[...] = jnp.zeros_like(acc_sc)

    # Head-invariant additive mask, computed once per (row, col) tile.
    bias = jnp.where(adj_ref[...].astype(jnp.float32) > 0.0, 0.0, NEG_INF)   # (TM, TK)
    feat = feat_ref[...]                                                     # (TK, H*F) bf16

    for hd in range(num_heads):                                    # static unroll
        lo = hd * out_feats

        # e[dst, src] = leaky_relu(el[src] + er[dst]) + mask bias
        e = er_ref[:, hd:hd + 1] + elt_ref[hd:hd + 1, :]           # (TM, TK)
        e = jnp.where(e >= 0.0, e, NEG_SLOPE * e) + bias

        # Online-softmax update for this column tile.
        m_old = m_sc[:, hd:hd + 1]                                 # (TM, 1)
        m_new = jnp.maximum(m_old, jnp.max(e, axis=-1, keepdims=True))
        alpha = jnp.exp(m_old - m_new)                             # (TM, 1)
        # Masked columns give exp(-1e30 - m) == 0 exactly (self-loops guaranteed).
        p = jnp.exp(e - m_new)                                     # (TM, TK)

        l_sc[:, hd:hd + 1] = alpha * l_sc[:, hd:hd + 1] + jnp.sum(p, axis=-1, keepdims=True)
        acc_sc[:, lo:lo + out_feats] = (
            alpha * acc_sc[:, lo:lo + out_feats]
            + jnp.dot(p.astype(feat.dtype), feat[:, lo:lo + out_feats],
                      preferred_element_type=jnp.float32))
        m_sc[:, hd:hd + 1] = m_new

    @pl.when(k == pl.num_programs(1) - 1)
    def _():
        # Per-head normalization happens in VMEM scratch; one lane-dense HBM store.
        for hd in range(num_heads):
            lo = hd * out_feats
            inv = pl.reciprocal(jnp.maximum(l_sc[:, hd:hd + 1], 1e-20), approx=True)
            acc_sc[:, lo:lo + out_feats] = acc_sc[:, lo:lo + out_feats] * inv
        out_ref[...] = acc_sc[...] + res_ref[...].astype(jnp.float32)


# --------------------------------------------------------------------------
# One GATConv layer (flatten(1) layout output).
# --------------------------------------------------------------------------
def gat_layer(h, adj_i8, w_bf, attn_mat, wres_bf, num_heads, out_feats, tm, tk):
    n, d_in = h.shape
    hf = num_heads * out_feats
    has_res_fc = wres_bf is not None
    assert n % tm == 0 and n % tk == 0, "padding in gat_forward guarantees this"

    # ---- Kernel A: projection / logits (and learned residual if needed) ----
    a_kernel = functools.partial(project_kernel, num_heads=num_heads,
                                 has_res_fc=has_res_fc)
    in_specs = [
        pl.BlockSpec((tm, d_in), lambda i: (i, 0)),                 # h tile
        pl.BlockSpec((d_in, hf), lambda i: (0, 0)),                 # W (bf16, resident)
        pl.BlockSpec((hf, 2 * num_heads), lambda i: (0, 0)),        # attn matrix
    ]
    out_shapes = [
        jax.ShapeDtypeStruct((n, hf), jnp.bfloat16),                # feat (lane-dense)
        jax.ShapeDtypeStruct((n, num_heads), jnp.float32),          # er (dst logits)
        jax.ShapeDtypeStruct((num_heads, n), jnp.float32),          # el (src logits, row layout)
    ]
    out_specs = [
        pl.BlockSpec((tm, hf), lambda i: (i, 0)),
        pl.BlockSpec((tm, num_heads), lambda i: (i, 0)),
        pl.BlockSpec((num_heads, tm), lambda i: (0, i)),
    ]
    args = [h, w_bf, attn_mat]
    if has_res_fc:
        in_specs.append(pl.BlockSpec((d_in, hf), lambda i: (0, 0)))       # Wres (bf16)
        out_shapes.append(jax.ShapeDtypeStruct((n, hf), jnp.bfloat16))    # projected residual
        out_specs.append(pl.BlockSpec((tm, hf), lambda i: (i, 0)))
        args.append(wres_bf)

    proj = pl.pallas_call(
        a_kernel,
        grid=(n // tm,),
        out_shape=tuple(out_shapes),
        in_specs=in_specs,
        out_specs=tuple(out_specs),
        compiler_params=pltpu.CompilerParams(
            dimension_semantics=("parallel",),
            vmem_limit_bytes=VMEM_LIMIT),
    )(*args)

    if has_res_fc:
        feat, er, elt, res = proj
    else:
        feat, er, elt = proj
        assert h.shape[1] == hf, "identity residual requires d_in == num_heads*out_feats"
        res = h                          # identity residual: direct add, no matmul

    # ---- Kernel B: online-softmax attention + aggregation + residual ----
    b_kernel = functools.partial(attention_kernel, num_heads=num_heads,
                                 out_feats=out_feats)
    cost = pl.CostEstimate(
        flops=2 * num_heads * n * n * out_feats + 8 * num_heads * n * n,
        transcendentals=num_heads * n * n,
        bytes_accessed=n * n + 6 * n * hf + 8 * n * num_heads,
    )
    out = pl.pallas_call(
        b_kernel,
        grid=(n // tm, n // tk),
        out_shape=jax.ShapeDtypeStruct((n, hf), jnp.float32),
        in_specs=[
            pl.BlockSpec((tm, tk), lambda i, k: (i, k)),            # adj tile (int8)
            pl.BlockSpec((tk, hf), lambda i, k: (k, 0)),            # feat column tile (bf16)
            pl.BlockSpec((num_heads, tk), lambda i, k: (0, k)),     # el src tile
            pl.BlockSpec((tm, num_heads), lambda i, k: (i, 0)),     # er dst tile
            pl.BlockSpec((tm, hf), lambda i, k: (i, 0)),            # residual dst tile
        ],
        out_specs=pl.BlockSpec((tm, hf), lambda i, k: (i, 0)),
        scratch_shapes=[
            pltpu.VMEM((tm, num_heads), jnp.float32),               # running max
            pltpu.VMEM((tm, num_heads), jnp.float32),               # running sum
            pltpu.VMEM((tm, hf), jnp.float32),                      # accumulator
        ],
        compiler_params=pltpu.CompilerParams(
            dimension_semantics=("parallel", "arbitrary"),
            vmem_limit_bytes=VMEM_LIMIT),
        cost_estimate=cost,
    )(adj_i8, feat, elt, er, res)
    return out


# --------------------------------------------------------------------------
# Parameters / driver
# --------------------------------------------------------------------------
def build_attn_mat(al, ar):
    """Block-diagonal (H*F, 2H) matrix: cols [0:H)=attn_l, [H:2H)=attn_r."""
    h, f = al.shape
    mat = jnp.zeros((h * f, 2 * h), jnp.float32)
    for hd in range(h):
        mat = mat.at[hd * f:(hd + 1) * f, hd].set(al[hd])
        mat = mat.at[hd * f:(hd + 1) * f, h + hd].set(ar[hd])
    return mat


def init_gat_params(key, num_layers, in_dim, num_hidden, num_heads):
    """num_layers + 1 GATConv layers (as in the reference constructor)."""
    params = []
    hf = num_hidden * num_heads
    dims_in = [in_dim] + [hf] * num_layers
    for l in range(num_layers + 1):
        d_in = dims_in[l]
        key, kw, kl, kr, ks = jax.random.split(key, 5)
        w = 0.1 * jax.random.normal(kw, (d_in, hf), jnp.float32)
        al = 0.1 * jax.random.normal(kl, (num_heads, num_hidden), jnp.float32)
        ar = 0.1 * jax.random.normal(kr, (num_heads, num_hidden), jnp.float32)
        if d_in == hf:
            wres = None   # residual = identity -> direct add inside the layer
        else:
            wres = (0.1 * jax.random.normal(ks, (d_in, hf), jnp.float32)
                    ).astype(jnp.bfloat16)
        params.append(dict(w=w.astype(jnp.bfloat16),
                           attn=build_attn_mat(al, ar),
                           wres=wres))
    return params


def _round_up(x, m):
    return ((x + m - 1) // m) * m


def gat_forward(params, adj, h, num_heads, num_hidden):
    n = adj.shape[0]
    if n <= BLOCK_M:
        tm = tk = n                                  # single tile; block == full array
    else:
        n_pad = _round_up(n, BLOCK_M)
        tm = BLOCK_M
        tk = BLOCK_K if n_pad % BLOCK_K == 0 else BLOCK_M
        if n_pad != n:                               # pad with isolated zero-degree nodes
            pad = n_pad - n
            adj = jnp.pad(adj, ((0, pad), (0, pad)))
            h = jnp.pad(h, ((0, pad), (0, 0)))

    adj_i8 = (adj != 0).astype(jnp.int8)             # 1 B/elem adjacency stream

    for p in params:
        # kernel output (N, H*F) is already the .flatten(1) layout
        h = gat_layer(h, adj_i8, p["w"], p["attn"], p["wres"],
                      num_heads, num_hidden, tm, tk)

    n_pad = h.shape[0]
    logits = h.reshape(n_pad, num_heads, num_hidden).mean(axis=1)   # final .mean(1)
    return logits[:n]


# --------------------------------------------------------------------------
# Pure-JAX reference (same bf16 weight rounding, f32 math) for validation.
# --------------------------------------------------------------------------
def gat_reference(params, adj, h, num_heads, num_hidden):
    mask = adj > 0
    for p in params:
        h_bf = h.astype(jnp.bfloat16).astype(jnp.float32)
        feat = h_bf @ p["w"].astype(jnp.float32)
        scores = feat @ p["attn"]
        el = scores[:, :num_heads]
        er = scores[:, num_heads:]
        featb = feat.astype(jnp.bfloat16).astype(jnp.float32)
        if p["wres"] is None:
            res = h
        else:
            res = h_bf @ p["wres"].astype(jnp.float32)
        outs = []
        for hd in range(num_heads):
            e = er[:, hd:hd + 1] + el[:, hd][None, :]
            e = jnp.where(e >= 0.0, e, NEG_SLOPE * e)
            e = jnp.where(mask, e, -jnp.inf)
            a = jax.nn.softmax(e, axis=1)
            outs.append(a @ featb[:, hd * num_hidden:(hd + 1) * num_hidden])
        h = jnp.concatenate(outs, axis=1) + res
    return h.reshape(h.shape[0], num_heads, num_hidden).mean(axis=1)


if __name__ == "__main__":
    # Small, module-consistent shapes.
    N = 32          # number of graph nodes
    IN_DIM = 16
    HIDDEN = 32
    HEADS = 2
    NUM_LAYERS = 2  # -> 3 GATConv layers total

    key = jax.random.PRNGKey(0)
    key, kh, ka = jax.random.split(key, 3)

    h0 = jax.random.normal(kh, (N, IN_DIM), jnp.float32)

    # Random sparse-ish adjacency WITH self loops: adj[dst, src].
    adj = (jax.random.uniform(ka, (N, N)) < 0.25).astype(jnp.float32)
    adj = jnp.maximum(adj, jnp.eye(N, dtype=jnp.float32))

    params = init_gat_params(key, NUM_LAYERS, IN_DIM, HIDDEN, HEADS)

    logits = gat_forward(params, adj, h0, HEADS, HIDDEN)
    logits = jax.block_until_ready(logits)

    assert logits.shape == (N, HIDDEN)
    assert bool(jnp.all(jnp.isfinite(logits)))

    # Numerical check vs pure-JAX reference (bf16 matmuls + approx recip drift).
    ref = gat_reference(params, adj, h0, HEADS, HIDDEN)
    err = float(jnp.max(jnp.abs(logits - ref)) / (jnp.max(jnp.abs(ref)) + 1e-6))
    assert err < 5e-2, f"kernel/reference mismatch: normalized max err = {err}"

    print("KERNEL_OK")
</pallas_src>

<mosaic_0001>
module attributes {stable_mosaic.version = 11 : i64} {
  func.func @project_kernel(%arg0: i32, %arg1: memref<32x16xf32, #tpu.memory_space<vmem>>, %arg2: memref<16x64xbf16, #tpu.memory_space<vmem>>, %arg3: memref<64x4xf32, #tpu.memory_space<vmem>>, %arg4: memref<16x64xbf16, #tpu.memory_space<vmem>>, %arg5: memref<32x64xbf16, #tpu.memory_space<vmem>>, %arg6: memref<32x2xf32, #tpu.memory_space<vmem>>, %arg7: memref<2x32xf32, #tpu.memory_space<vmem>>, %arg8: memref<32x64xbf16, #tpu.memory_space<vmem>>) attributes {dimension_semantics = [#tpu.dimension_semantics<parallel>], iteration_bounds = array<i64: 1>, scalar_prefetch = 0 : i64, scratch_operands = 0 : i64, tpu.core_type = #tpu.core_type<tc>, window_params = [{transform_indices = @transform_0, window_bounds = array<i64: 32, 16>}, {pipeline_mode = #tpu.pipeline_mode<synchronous>, transform_indices = @transform_1, window_bounds = array<i64: 16, 64>}, {pipeline_mode = #tpu.pipeline_mode<synchronous>, transform_indices = @transform_2, window_bounds = array<i64: 64, 4>}, {pipeline_mode = #tpu.pipeline_mode<synchronous>, transform_indices = @transform_3, window_bounds = array<i64: 16, 64>}, {transform_indices = @transform_4, window_bounds = array<i64: 32, 64>}, {transform_indices = @transform_5, window_bounds = array<i64: 32, 2>}, {transform_indices = @transform_6, window_bounds = array<i64: 2, 32>}, {transform_indices = @transform_7, window_bounds = array<i64: 32, 64>}]} {
    %c0 = arith.constant 0 : index
    %c0_0 = arith.constant 0 : index
    %0 = vector.load %arg1[%c0, %c0_0] : memref<32x16xf32, #tpu.memory_space<vmem>>, vector<32x16xf32>
    %1 = arith.truncf %0 : vector<32x16xf32> to vector<32x16xbf16>
    %c0_1 = arith.constant 0 : index
    %c0_2 = arith.constant 0 : index
    %2 = vector.load %arg2[%c0_1, %c0_2] : memref<16x64xbf16, #tpu.memory_space<vmem>>, vector<16x64xbf16>
    %cst = arith.constant dense<0.000000e+00> : vector<32x64xf32>
    %3 = tpu.matmul %1, %2, %cst {dimension_numbers = #tpu.dot_dimension_numbers<[1], [0], [0], [1], [0, 0, 1, 1], [], []>} : vector<32x16xbf16>, vector<16x64xbf16>, vector<32x64xf32> -> vector<32x64xf32>
    %4 = arith.truncf %3 : vector<32x64xf32> to vector<32x64xbf16>
    %c0_3 = arith.constant 0 : index
    %c0_4 = arith.constant 0 : index
    %5 = vector.load %arg5[%c0_3, %c0_4] : memref<32x64xbf16, #tpu.memory_space<vmem>>, vector<32x64xbf16>
    tpu.vector_store %arg5[%c0_3, %c0_4], %4 {strides = array<i32>} : memref<32x64xbf16, #tpu.memory_space<vmem>>, vector<32x64xbf16>,
    %c0_5 = arith.constant 0 : index
    %c0_6 = arith.constant 0 : index
    %6 = vector.load %arg3[%c0_5, %c0_6] : memref<64x4xf32, #tpu.memory_space<vmem>>, vector<64x4xf32>
    %cst_7 = arith.constant dense<0.000000e+00> : vector<32x4xf32>
    %7 = tpu.matmul %3, %6, %cst_7 {dimension_numbers = #tpu.dot_dimension_numbers<[1], [0], [0], [1], [0, 0, 1, 1], [], []>} : vector<32x64xf32>, vector<64x4xf32>, vector<32x4xf32> -> vector<32x4xf32>
    %8 = vector.extract_strided_slice %7 {offsets = [0, 2], sizes = [32, 2], strides = [1, 1]} : vector<32x4xf32> to vector<32x2xf32>
    %c0_8 = arith.constant 0 : index
    %c0_9 = arith.constant 0 : index
    %9 = vector.load %arg6[%c0_8, %c0_9] : memref<32x2xf32, #tpu.memory_space<vmem>>, vector<32x2xf32>
    tpu.vector_store %arg6[%c0_8, %c0_9], %8 {strides = array<i32>} : memref<32x2xf32, #tpu.memory_space<vmem>>, vector<32x2xf32>,
    %10 = vector.extract_strided_slice %7 {offsets = [0, 0], sizes = [32, 2], strides = [1, 1]} : vector<32x4xf32> to vector<32x2xf32>
    %11 = tpu.transpose %10, [1, 0] : vector<32x2xf32> -> vector<2x32xf32>
    %c0_10 = arith.constant 0 : index
    %c0_11 = arith.constant 0 : index
    %12 = vector.load %arg7[%c0_10, %c0_11] : memref<2x32xf32, #tpu.memory_space<vmem>>, vector<2x32xf32>
    tpu.vector_store %arg7[%c0_10, %c0_11], %11 {strides = array<i32>} : memref<2x32xf32, #tpu.memory_space<vmem>>, vector<2x32xf32>,
    %c0_12 = arith.constant 0 : index
    %c0_13 = arith.constant 0 : index
    %13 = vector.load %arg4[%c0_12, %c0_13] : memref<16x64xbf16, #tpu.memory_space<vmem>>, vector<16x64xbf16>
    %cst_14 = arith.constant dense<0.000000e+00> : vector<32x64xf32>
    %14 = tpu.matmul %1, %13, %cst_14 {dimension_numbers = #tpu.dot_dimension_numbers<[1], [0], [0], [1], [0, 0, 1, 1], [], []>} : vector<32x16xbf16>, vector<16x64xbf16>, vector<32x64xf32> -> vector<32x64xf32>
    %15 = arith.truncf %14 : vector<32x64xf32> to vector<32x64xbf16>
    %c0_15 = arith.constant 0 : index
    %c0_16 = arith.constant 0 : index
    %16 = vector.load %arg8[%c0_15, %c0_16] : memref<32x64xbf16, #tpu.memory_space<vmem>>, vector<32x64xbf16>
    tpu.vector_store %arg8[%c0_15, %c0_16], %15 {strides = array<i32>} : memref<32x64xbf16, #tpu.memory_space<vmem>>, vector<32x64xbf16>,
    return
  }
  func.func @transform_0(%arg0: i32) -> (i32, i32) {
    %c0_i32 = arith.constant 0 : i32
    %c0_i32_0 = arith.constant 0 : i32
    return %arg0, %c0_i32 : i32, i32
  }
  func.func @transform_1(%arg0: i32) -> (i32, i32) {
    %c0_i32 = arith.constant 0 : i32
    %c0_i32_0 = arith.constant 0 : i32
    %c0_i32_1 = arith.constant 0 : i32
    return %c0_i32, %c0_i32_0 : i32, i32
  }
  func.func @transform_2(%arg0: i32) -> (i32, i32) {
    %c0_i32 = arith.constant 0 : i32
    %c0_i32_0 = arith.constant 0 : i32
    %c0_i32_1 = arith.constant 0 : i32
    return %c0_i32, %c0_i32_0 : i32, i32
  }
  func.func @transform_3(%arg0: i32) -> (i32, i32) {
    %c0_i32 = arith.constant 0 : i32
    %c0_i32_0 = arith.constant 0 : i32
    %c0_i32_1 = arith.constant 0 : i32
    return %c0_i32, %c0_i32_0 : i32, i32
  }
  func.func @transform_4(%arg0: i32) -> (i32, i32) {
    %c0_i32 = arith.constant 0 : i32
    %c0_i32_0 = arith.constant 0 : i32
    return %arg0, %c0_i32 : i32, i32
  }
  func.func @transform_5(%arg0: i32) -> (i32, i32) {
    %c0_i32 = arith.constant 0 : i32
    %c0_i32_0 = arith.constant 0 : i32
    return %arg0, %c0_i32 : i32, i32
  }
  func.func @transform_6(%arg0: i32) -> (i32, i32) {
    %c0_i32 = arith.constant 0 : i32
    %c0_i32_0 = arith.constant 0 : i32
    return %c0_i32, %arg0 : i32, i32
  }
  func.func @transform_7(%arg0: i32) -> (i32, i32) {
    %c0_i32 = arith.constant 0 : i32
    %c0_i32_0 = arith.constant 0 : i32
    return %arg0, %c0_i32 : i32, i32
  }
}

</mosaic_0001>

<bundles_post_ra>
// kernel: tpu_custom_call.1
= control target key start
LH: loop header
LB: loop body
LE: loop exit
PB: predicated region body
PF: predicated region fallthrough
CT: control target
= control target key end

     0   :  { %13 = vsyncpa [#allocation3], 0  ;;  %s964_s0 = inlined_call_operand.hbm [shape: f32[32,16], index: 0, kind: input, shape index: {}]   ;;  %s965_s1 = inlined_call_operand.hbm [shape: bf16[16,64], index: 1, kind: input, shape index: {}]   ;;  %s966_s2 = inlined_call_operand.hbm [shape: f32[64,4], index: 2, kind: input, shape index: {}]   ;;  %s967_s3 = inlined_call_operand.hbm [shape: bf16[16,64], index: 3, kind: input, shape index: {}]   ;;  %s968_s4 = inlined_call_operand.hbm [shape: bf16[32,64], index: 4, kind: output, shape index: {0}]   ;;  %s969_s5 = inlined_call_operand.hbm [shape: f32[32,2], index: 5, kind: output, shape index: {1}]   ;;  %s970_s6 = inlined_call_operand.hbm [shape: f32[2,32], index: 6, kind: output, shape index: {2}]   ;;  %s971_s7 = inlined_call_operand.hbm [shape: bf16[32,64], index: 7, kind: output, shape index: {3}]  }
   0x1   :  { %14 = vsyncpa [#allocation6], 0 }
   0x2   :  { %15 = vsyncpa [#allocation9], 0 }
   0x3   :  { %16 = vsyncpa [#allocation4], 0 }
   0x4   :  { %17 = vsyncpa [#allocation12], 0 }
   0x5   :  { %18 = vsyncpa [#allocation15], 0  ;;  %s771_s24 = smov [#allocation5]   ;;  %s583_s28 = scalar_lea.hbm %s965_s1, 128 }
   0x6   :  { %s36_s25 = sshll.u32 %s771_s24, 4  ;;  %p584_p0 = scmp.ne.s32.totalorder %s965_s1, %s583_s28  ;;  %s37_s25 = int_to_ptr.vmem [resolvable:$true] %s36_s25 }
   0x7   :  { %p587_p1 = scmp.lt.u32.totalorder %s583_s28, %s965_s1 }
   0x9   :  { %p589_p2 = pnand %p587_p1, %p584_p0 }
   0xb   :  { %592 = shalt.err (!%p589_p2)
}
   0xc   :  { %s593_s10 = scalar_lea.vmem %s37_s25, 128  ;;  %p598_p4 = scmp.lt.s32.totalorder %s37_s25, %s37_s25 }
   0xd   :  { %p594_p3 = scmp.ne.s32.totalorder %s37_s25, %s593_s10  ;;  %p599_p5 = scmp.lt.s32.totalorder %s593_s10, %s593_s10 }
   0xf   :  { %p600_p6 = por %p599_p5, %p598_p4 }
  0x11   :  { %p601_p7 = pnand %p600_p6, %p594_p3 }
  0x13   :  { %604 = shalt.err (!%p601_p7)
}
  0x14   :  { %s772_s11 = smov 64   ;;  %s773_s12 = smov 4  }
  0x15   :  { %42 = dma.hbm_to_vmem [thread:$0]  %s965_s1, 128, %s37_s25, [#allocation6], %s772_s11, %s772_s11, %s773_s12  }
  0x16   :  { %s774_s15 = smov [#allocation2]   ;;  %s605_s19 = scalar_lea.hbm %s964_s0, 512 }
  0x17   :  { %s24_s16 = sshll.u32 %s774_s15, 4  ;;  %p606_p8 = scmp.ne.s32.totalorder %s964_s0, %s605_s19  ;;  %s25_s16 = int_to_ptr.vmem [resolvable:$true] %s24_s16 }
  0x18   :  { %p609_p9 = scmp.lt.u32.totalorder %s605_s19, %s964_s0 }
  0x1a   :  { %p611_p10 = pnand %p609_p9, %p606_p8 }
  0x1c   :  { %614 = shalt.err (!%p611_p10)
}
  0x1d   :  { %s615_s24 = scalar_lea.vmem %s25_s16, 512  ;;  %p620_p12 = scmp.lt.s32.totalorder %s25_s16, %s25_s16 }
  0x1e   :  { %p616_p11 = scmp.ne.s32.totalorder %s25_s16, %s615_s24  ;;  %p621_p13 = scmp.lt.s32.totalorder %s615_s24, %s615_s24 }
  0x20   :  { %p622_p0 = por %p621_p13, %p620_p12 }
  0x22   :  { %p623_p1 = pnand %p622_p0, %p616_p11 }
  0x24   :  { %626 = shalt.err (!%p623_p1)
}
  0x25   :  { %s775_s1 = smov 128   ;;  %s776_s25 = smov 8  }
  0x26   :  { %30 = dma.hbm_to_vmem [thread:$0]  %s964_s0, 512, %s25_s16, [#allocation3], %s775_s1, %s775_s1, %s776_s25  }
  0x27   :  { %s777_s28 = smov [#allocation7]   ;;  %s778_s30 = smov [#allocation8]  }
  0x28   :  { %s48_s29 = sshll.u32 %s777_s28, 4  ;;  %s60_s8 = sshll.u32 %s778_s30, 4  ;;  %s49_s29 = int_to_ptr.vmem [resolvable:$true] %s48_s29  ;;  %s854_s8 = int_to_ptr.vmem [resolvable:$true] %s60_s8 }
  0x29   :  { %s627_s13 = scalar_lea.hbm %s966_s2, 1024 }
  0x2a   :  { %p628_p2 = scmp.ne.s32.totalorder %s966_s2, %s627_s13  ;;  %p631_p3 = scmp.lt.u32.totalorder %s627_s13, %s966_s2 }
  0x2c   :  { %p633_p4 = pnand %p631_p3, %p628_p2 }
  0x2e   :  { %636 = shalt.err (!%p633_p4)
}
  0x2f   :  { %s637_s0 = scalar_lea.vmem %s49_s29, 1024  ;;  %p642_p6 = scmp.lt.s32.totalorder %s49_s29, %s49_s29 }
  0x30   :  { %p638_p5 = scmp.ne.s32.totalorder %s49_s29, %s637_s0  ;;  %p643_p7 = scmp.lt.s32.totalorder %s637_s0, %s637_s0 }
  0x32   :  { %p644_p8 = por %p643_p7, %p642_p6 }
  0x34   :  { %p645_p9 = pnand %p644_p8, %p638_p5 }
  0x36   :  { %648 = shalt.err (!%p645_p9)
}
  0x37   :  { %54 = dma.hbm_to_vmem [thread:$0]  %s966_s2, 1024, %s49_s29, [#allocation6], %s775_s1, %s775_s1, %s776_s25  }
  0x38   :  { %s649_s22 = scalar_lea.hbm %s967_s3, 128 }
  0x39   :  { %p650_p10 = scmp.ne.s32.totalorder %s967_s3, %s649_s22  ;;  %p653_p11 = scmp.lt.u32.totalorder %s649_s22, %s967_s3 }
  0x3b   :  { %p655_p12 = pnand %p653_p11, %p650_p10 }
  0x3d   :  { %658 = shalt.err (!%p655_p12)
}
  0x3e   :  { %s659_s28 = scalar_lea.vmem %s854_s8, 128  ;;  %p664_p0 = scmp.lt.s32.totalorder %s854_s8, %s854_s8 }
  0x3f   :  { %p660_p13 = scmp.ne.s32.totalorder %s854_s8, %s659_s28  ;;  %p665_p1 = scmp.lt.s32.totalorder %s659_s28, %s659_s28 }
  0x41   :  { %p666_p2 = por %p665_p1, %p664_p0 }
  0x43   :  { %p667_p3 = pnand %p666_p2, %p660_p13 }
  0x45   :  { %670 = shalt.err (!%p667_p3)
}
  0x46   :  { %66 = dma.hbm_to_vmem [thread:$0]  %s967_s3, 128, %s854_s8, [#allocation9], %s772_s11, %s772_s11, %s773_s12  }
  0x47   :  { %759 = dma.done.wait [#allocation3], 512  }
  0x48   :  { %760 = vsyncadd [#allocation3], 4294966784 }
  0x49   :  { %761 = dma.done.wait [#allocation6], 1152  }
  0x4a   :  { %762 = vsyncadd [#allocation6], 4294966144 }
  0x4b   :  { %763 = dma.done.wait [#allocation9], 128  }
  0x4c   :  { %764 = vsyncadd [#allocation9], 4294967168  ;;  %v581_v0 = vld [vmem:[#allocation5] sm:$0xff]   ;;  %v81_v2 = vld [vmem:[#allocation2 + $0x8] sm:$0xff]  ;;  %vm94_vm0 = vcmask 130048   ;;  %vm179_vm1 = vcmask 523264  }
  0x4d   :  { %v80_v1 = vld [vmem:[#allocation2] sm:$0xff]  ;;  %v82_v3 = vld [vmem:[#allocation2 + $0x10] sm:$0xff]  ;;  %517 = vmatprep.subr.bf16.mxu0 %v581_v0  ;;  %v83_v5 = vld [vmem:[#allocation2 + $0x18] sm:$0xff]  ;;  %vm166_vm2 = vcmask 519168   ;;  %s779_s3 = smov 126   ;;  %s780_s30 = smov [#allocation10]  }
  0x4e   :  { %v84_v4 = vpack.c.bf16 %v81_v2, %v80_v1  ;;  %v171_v6 = vld [vmem:[#allocation7] sm:$0xff]  ;;  %v172_v7 = vld [vmem:[#allocation7 + $0x8] sm:$0xff]  ;;  %518 = vmatpush3.bf16.msra.mxu0 %v581_v0  ;;  %v85_v8 = vpack.c.bf16 %v83_v5, %v82_v3  ;;  %v173_v10 = vld [vmem:[#allocation7 + $0x10] sm:$0xff]  ;;  %s414_s8 = sshll.u32 %s780_s30, 4  ;;  %s415_s8 = int_to_ptr.vmem [resolvable:$true] %s414_s8 }
  0x4f   :  { %v551_v9 = vpack.c.bf16 %v172_v7, %v171_v6  ;;  %v174_v11 = vld [vmem:[#allocation7 + $0x18] sm:$0xff]  ;;  %v175_v12 = vld [vmem:[#allocation7 + $0x20] sm:$0xff]  ;;  %v176_v14 = vld [vmem:[#allocation7 + $0x28] sm:$0xff]  ;;  %s671_s9 = scalar_lea.vmem %s415_s8, 256  ;;  %p676_p5 = scmp.lt.s32.totalorder %s415_s8, %s415_s8 }
  0x50   :  { %519 = vmatprep.mubr.msk.bf16.mxu0 %vm94_vm0, %v84_v4  ;;  %v555_v13 = vpack.c.bf16 %v174_v11, %v173_v10  ;;  %v559_v15 = vpack.c.bf16 %v176_v14, %v175_v12  ;;  %v177_v16 = vld [vmem:[#allocation7 + $0x30] sm:$0xff]  ;;  %v178_v17 = vld [vmem:[#allocation7 + $0x38] sm:$0xff]  ;;  %v582_v19 = vld [vmem:[#allocation8] sm:$0xff]   ;;  %p672_p4 = scmp.ne.s32.totalorder %s415_s8, %s671_s9  ;;  %p677_p6 = scmp.lt.s32.totalorder %s671_s9, %s671_s9 }
  0x51   :  { %552 = vmatprep.subr.bf16.mxu1 %v551_v9  ;;  %520 = vmatmul.mubr.msk.bf16.vlgmr.msra.gmra.mrb[0].mxu0 %vm94_vm0, %v85_v8  ;;  %v563_v18 = vpack.c.bf16 %v178_v17, %v177_v16 }
  0x52   :  { %554 = vmatpush3.bf16.msra.mxu1 %v551_v9  ;;  %547 = vmatprep.mubr.msk.bf16.mxu0 %vm94_vm0, %v84_v4  ;;  %p678_p7 = por %p677_p6, %p676_p5 }
  0x53   :  { %556 = vmatprep.subr.bf16.mxu1 %v555_v13  ;;  %545 = vmatprep.subr.bf16.mxu0 %v582_v19 }
  0x54   :  { %546 = vmatpush3.bf16.msra.mxu0 %v582_v19  ;;  %p679_p8 = pnand %p678_p7, %p672_p4 }
  0x56   :  { %558 = vmatpush3.bf16.msra.mxu1 %v555_v13 }
  0x57   :  { %560 = vmatprep.subr.bf16.mxu1 %v559_v15 }
  0x59   :  { %548 = vmatmul.mubr.msk.bf16.vlgmr.msra.gmra.mrb[4].mxu0 %vm94_vm0, %v85_v8 }
  0x5a   :  { %562 = vmatpush3.bf16.msra.mxu1 %v559_v15 }
  0x5b   :  { %564 = vmatprep.subr.bf16.mxu1 %v563_v18 }
  0x5e   :  { %566 = vmatpush3.bf16.msra.mxu1 %v563_v18 }
 0x124   :  { %v521_v20 = vpop.f32.mrb[0].mxu0 }
 0x125   :  { %v493_v21 = vpack.c.bf16 %v521_v20, %v521_v20  ;;  %v135_v22 = vpop.f32.mrb[1].mxu0 }
 0x126   :  { %v491_v23 = vpack.c.bf16 %v135_v22, %v135_v22  ;;  %v522_v24 = vpop.f32.mrb[2].mxu0  ;;  %539 = vmatprep.mubr.msk.f32.mxu1 %vm179_vm1, %v135_v22 }
 0x127   :  { %169 = vst.msk [vmem:[#allocation10 + $0x8] sm:$0xf] %vm166_vm2, %v493_v21  ;;  %v494_v25 = vpack.c.bf16 %v522_v24, %v522_v24  ;;  %v138_v26 = vpop.f32.mrb[3].mxu0 }
 0x128   :  { %167 = vst.msk [vmem:[#allocation10] sm:$0xf] %vm166_vm2, %v491_v23  ;;  %v492_v27 = vpack.c.bf16 %v138_v26, %v138_v26  ;;  %540 = vmatmul.mubr.msk.f32.vlgmr.msra.gmra.mrb[0].mxu1 %vm179_vm1, %v138_v26 }
 0x129   :  { %170 = vst.msk [vmem:[#allocation10 + $0xc] sm:$0xf] %vm166_vm2, %v494_v25  ;;  %542 = vmatprep.mubr.msk.f32.mxu1 %vm179_vm1, %v521_v20 }
 0x12a   :  { %168 = vst.msk [vmem:[#allocation10 + $0x4] sm:$0xf] %vm166_vm2, %v492_v27 }
 0x12c   :  { %543 = vmatmul.mubr.msk.f32.gmra.mrb[2].mxu1 %vm179_vm1, %v522_v24  ;;  %v549_v28 = vpop.f32.mrb[4].mxu0 }
 0x12d   :  { %v497_v29 = vpack.c.bf16 %v549_v28, %v549_v28  ;;  %v374_v30 = vpop.f32.mrb[5].mxu0 }
 0x12e   :  { %v495_v31 = vpack.c.bf16 %v374_v30, %v374_v30  ;;  %v550_v32 = vpop.f32.mrb[6].mxu0 }
 0x12f   :  { %407 = vst.msk [vmem:[#allocation14 + $0x8] sm:$0xf] %vm166_vm2, %v497_v29  ;;  %v498_v34 = vpack.c.bf16 %v550_v32, %v550_v32  ;;  %v377_v35 = vpop.f32.mrb[7].mxu0 }
 0x130   :  { %405 = vst.msk [vmem:[#allocation14] sm:$0xf] %vm166_vm2, %v495_v31  ;;  %v496_v37 = vpack.c.bf16 %v377_v35, %v377_v35 }
 0x131   :  { %408 = vst.msk [vmem:[#allocation14 + $0xc] sm:$0xf] %vm166_vm2, %v498_v34 }
 0x132   :  { %406 = vst.msk [vmem:[#allocation14 + $0x4] sm:$0xf] %vm166_vm2, %v496_v37 }
 0x1fb   :  { %v541_v33 = vpop.f32.mrb[0].mxu1 }
 0x1fc   :  { %283 = vrot.lane.b32.xlu0 %v541_v33, %s779_s3  ;;  %v258_v36 = vpop.f32.mrb[1].mxu1 }
 0x1ff   :  { %v544_v38 = vpop.f32.mrb[2].mxu1 }
 0x200   :  { %281 = vrot.lane.b32.xlu0 %v258_v36, %s779_s3  ;;  %v268_v39 = vpop.f32.mrb[3].mxu1 }
 0x201   :  { %285 = vrot.lane.b32.xlu1 %v268_v39, %s779_s3 }
 0x205   :  { %287 = vrot.lane.b32.xlu1 %v544_v38, %s779_s3 }
 0x21e   :  { %298 = vxpose.xlu0.b32.start [1/4] (short) (narrow) %v258_v36, 8 }
 0x21f   :  { %682 = shalt.err (!%p679_p8)
}
 0x220   :  { %s683_s14 = scalar_lea.hbm %s968_s4, 256 }
 0x221   :  { %p684_p9 = scmp.ne.s32.totalorder %s968_s4, %s683_s14  ;;  %p687_p10 = scmp.lt.u32.totalorder %s683_s14, %s968_s4 }
 0x223   :  { %p689_p11 = pnand %p687_p10, %p684_p9 }
 0x225   :  { %692 = shalt.err (!%p689_p11)
}
 0x226   :  { %420 = dma.vmem_to_hbm [thread:$0]  %s415_s8, 256, %s968_s4, [#allocation4], %s772_s11, %s772_s11, %s773_s12   ;;  %299 = vxpose.xlu0.b32.cont [2/4] (short) (narrow) %v541_v33, 8 }
 0x227   :  { %s781_s20 = smov [#allocation14]  }
 0x228   :  { %s448_s21 = sshll.u32 %s781_s20, 4  ;;  %s449_s21 = int_to_ptr.vmem [resolvable:$true] %s448_s21 }
 0x229   :  { %s693_s22 = scalar_lea.vmem %s449_s21, 256  ;;  %p698_p13 = scmp.lt.s32.totalorder %s449_s21, %s449_s21 }
 0x22a   :  { %p694_p12 = scmp.ne.s32.totalorder %s449_s21, %s693_s22  ;;  %p699_p0 = scmp.lt.s32.totalorder %s693_s22, %s693_s22 }
 0x22c   :  { %p700_p1 = por %p699_p0, %p698_p13 }
 0x22e   :  { %p701_p2 = pnand %p700_p1, %p694_p12 }
 0x230   :  { %704 = shalt.err (!%p701_p2)
}
 0x231   :  { %s705_s26 = scalar_lea.hbm %s971_s7, 256 }
 0x232   :  { %p706_p3 = scmp.ne.s32.totalorder %s971_s7, %s705_s26  ;;  %p709_p4 = scmp.lt.u32.totalorder %s705_s26, %s971_s7 }
 0x234   :  { %p711_p5 = pnand %p709_p4, %p706_p3 }
 0x236   :  { %714 = shalt.err (!%p711_p5)
}
 0x237   :  { %454 = dma.vmem_to_hbm [thread:$0]  %s449_s21, 256, %s971_s7, [#allocation15], %s772_s11, %s772_s11, %s773_s12   ;;  %300 = vxpose.xlu0.b32.cont [3/4] (short) (narrow) %v268_v39, 8  ;;  %vm293_vm3 = vcmask 15360  }
 0x238   :  { %s782_s30 = smov [#allocation11]  }
 0x239   :  { %s426_s8 = sshll.u32 %s782_s30, 4  ;;  %s427_s8 = int_to_ptr.vmem [resolvable:$true] %s426_s8 }
 0x23a   :  { %s715_s9 = scalar_lea.vmem %s427_s8, 512  ;;  %p720_p7 = scmp.lt.s32.totalorder %s427_s8, %s427_s8 }
 0x23b   :  { %301 = vxpose.xlu0.b32.end [4/4] (short) (narrow) %v544_v38, 8  ;;  %p716_p6 = scmp.ne.s32.totalorder %s427_s8, %s715_s9  ;;  %p721_p8 = scmp.lt.s32.totalorder %s715_s9, %s715_s9 }
 0x23d   :  { %p722_p9 = por %p721_p8, %p720_p7 }
 0x23f   :  { %p723_p10 = pnand %p722_p9, %p716_p6 }
 0x26e   :  { %v284_v40 = vpop.permute.xlu0 %283 }
 0x26f   :  { %295 = vst.msk [vmem:[#allocation11 + $0x8] sm:$0xff] %vm293_vm3, %v284_v40 }
 0x272   :  { %v282_v41 = vpop.permute.xlu0 %281 }
 0x273   :  { %294 = vst.msk [vmem:[#allocation11] sm:$0xff] %vm293_vm3, %v282_v41  ;;  %v286_v42 = vpop.permute.xlu1 %285 }
 0x274   :  { %296 = vst.msk [vmem:[#allocation11 + $0x10] sm:$0xff] %vm293_vm3, %v286_v42 }
 0x277   :  { %v288_v43 = vpop.permute.xlu1 %287 }
 0x278   :  { %297 = vst.msk [vmem:[#allocation11 + $0x18] sm:$0xff] %vm293_vm3, %v288_v43 }
 0x279   :  { %726 = shalt.err (!%p723_p10)
}
 0x27a   :  { %s727_s12 = scalar_lea.hbm %s969_s5, 512 }
 0x27b   :  { %p728_p11 = scmp.ne.s32.totalorder %s969_s5, %s727_s12  ;;  %p731_p12 = scmp.lt.u32.totalorder %s727_s12, %s969_s5 }
 0x27d   :  { %p733_p13 = pnand %p731_p12, %p728_p11 }
 0x27f   :  { %736 = shalt.err (!%p733_p13)
}
 0x280   :  { %432 = dma.vmem_to_hbm [thread:$0]  %s427_s8, 512, %s969_s5, [#allocation12], %s775_s1, %s775_s1, %s776_s25   ;;  %vm330_vm4 = vcmask 254976  }
 0x281   :  { %s783_s0 = smov [#allocation13]  }
 0x282   :  { %s439_s16 = sshll.u32 %s783_s0, 4  ;;  %s440_s16 = int_to_ptr.vmem [resolvable:$true] %s439_s16 }
 0x283   :  { %s737_s19 = scalar_lea.vmem %s440_s16, 32  ;;  %p742_p1 = scmp.lt.s32.totalorder %s440_s16, %s440_s16 }
 0x284   :  { %p738_p0 = scmp.ne.s32.totalorder %s440_s16, %s737_s19  ;;  %p743_p2 = scmp.lt.s32.totalorder %s737_s19, %s737_s19 }
 0x286   :  { %p744_p3 = por %p743_p2, %p742_p1 }
 0x288   :  { %p745_p4 = pnand %p744_p3, %p738_p0 }
 0x2af   :  { %v314_v44 = vpop.trf.xlu0 }
 0x2b0   :  { %331 = vst.msk [vmem:[#allocation13] sm:$0x3] %vm330_vm4, %v314_v44 }
 0x2b1   :  { %748 = shalt.err (!%p745_p4)
}
 0x2b2   :  { %s749_s22 = scalar_lea.hbm %s970_s6, 32 }
 0x2b3   :  { %p750_p5 = scmp.ne.s32.totalorder %s970_s6, %s749_s22  ;;  %p753_p6 = scmp.lt.u32.totalorder %s749_s22, %s970_s6 }
 0x2b5   :  { %p755_p7 = pnand %p753_p6, %p750_p5 }
 0x2b7   :  { %758 = shalt.err (!%p755_p7)
}
 0x2b8   :  { %442 = dma.vmem_to_hbm [thread:$0]  %s440_s16, 32, %s970_s6, [#allocation12]  }
 0x2b9   :  { %765 = dma.done.wait [#allocation4], 256  }
 0x2ba   :  { %766 = vsyncadd [#allocation4], 4294967040 }
 0x2bb   :  { %767 = dma.done.wait [#allocation12], 544  }
 0x2bc   :  { %768 = vsyncadd [#allocation12], 4294966752 }
 0x2bd   :  { %769 = dma.done.wait [#allocation15], 256  }
 0x2be   :  { %770 = vsyncadd [#allocation15], 4294967040 }
 0x2bf   :  { %467 = vsyncpa [#allocation3], 1 }
 0x2c0   :  { %468 = vsyncpa [#allocation6], 1 }
 0x2c1   :  { %469 = vsyncpa [#allocation9], 1 }
 0x2c2   :  { %470 = vsyncpa [#allocation4], 1 }
 0x2c3   :  { %471 = vsyncpa [#allocation12], 1 }
 0x2c4   :  { %472 = vsyncpa [#allocation15], 1 }

</bundles_post_ra>
